<compile_context>
chip_gen: v7x
topology: tpu7x:2x2x1
jax: 0.10.0
libtpu: 0.0.40
codegen_flags: <defaults>
</compile_context>

<pallas_src>
import jax
import jax.numpy as jnp
from jax.experimental import pallas as pl
from jax.experimental.pallas import tpu as pltpu

_LANE = 128      # TPU lane width; fused hidden / output widths padded to this.
_SUBLANE = 8     # f32 sublane count; batch tiles padded to this.
_MAX_TB = 512    # cap on the batch tile (keeps VMEM small, lets big batches
                 # split across grid steps / megacore).


def _round_up(x, m):
    return ((x + m - 1) // m) * m


# ---------------------------------------------------------------------------
# Kernel: one batch tile of both twin critics, fused into 3 MXU matmuls.
# ---------------------------------------------------------------------------
def _fused_double_q_kernel(state_ref, action_ref,
                           w1s_ref, w1a_ref, w2_ref, w3_ref, bias_ref,
                           out_ref):
    hf = w1s_ref.shape[1]          # fused (padded) hidden width
    out_w = out_ref.shape[1]       # lane-dense output width (multiple of 128)

    bias = bias_ref[...]           # (3, hf) packed bias slab, one DMA
    b1 = bias[0:1, :hf]
    b2 = bias[1:2, :hf]
    b3 = bias[2:3, :out_w]

    # Layer 1: split-K matmul (state part + action part) replaces the concat.
    h1 = (jnp.dot(state_ref[...], w1s_ref[...],
                  preferred_element_type=jnp.float32)
          + jnp.dot(action_ref[...], w1a_ref[...],
                    preferred_element_type=jnp.float32)
          + b1)
    h1 = jnp.maximum(h1, 0.0)

    # Layer 2: block-diagonal fused hidden->hidden (one MXU pass for both nets).
    h2 = jnp.maximum(
        jnp.dot(h1, w2_ref[...], preferred_element_type=jnp.float32) + b2, 0.0)

    # Layer 3: block-diagonal hidden->2, zero-padded to a full lane width so
    # the output store is a single unmasked, lane-dense vst.
    out_ref[...] = (jnp.dot(h2, w3_ref[...],
                            preferred_element_type=jnp.float32)
                    + b3).astype(out_ref.dtype)


# ---------------------------------------------------------------------------
# One-time (outside jit) parameter fusion / packing.
# ---------------------------------------------------------------------------
def fuse_critic_params(params1, params2, state_dim):
    """Fuse two CriticNet param sets into one lane-dense weight chain.

    Each params tuple is (W1 (in,H), b1 (1,H), W2 (H,H), b2 (1,H), W3 (H,1),
    b3 (1,1)).  Returns (w1_state, w1_action, w2_fused, w3_fused, bias_pack),
    all float32, all lane-padded so the kernel only does dense matmuls.
    """
    w1a, b1a, w2a, b2a, w3a, b3a = params1
    w1b, b1b, w2b, b2b, w3b, b3b = params2
    in_dim, hidden = w1a.shape

    hf = max(_LANE, _round_up(2 * hidden, _LANE))   # fused + padded hidden
    out_w = _LANE                                   # lane-dense output width

    # Layer 1: column-stack W1a | W1b, zero-pad to hf columns.
    w1f = jnp.zeros((in_dim, hf), jnp.float32)
    w1f = w1f.at[:, :hidden].set(w1a).at[:, hidden:2 * hidden].set(w1b)
    b1f = (jnp.zeros((hf,), jnp.float32)
           .at[:hidden].set(b1a.reshape(-1))
           .at[hidden:2 * hidden].set(b1b.reshape(-1)))

    # Layer 2: block-diagonal, zero-padded to (hf, hf).  ReLU is elementwise
    # and the blocks never mix, so this is exactly the two separate critics.
    w2f = jnp.zeros((hf, hf), jnp.float32)
    w2f = (w2f.at[:hidden, :hidden].set(w2a)
              .at[hidden:2 * hidden, hidden:2 * hidden].set(w2b))
    b2f = (jnp.zeros((hf,), jnp.float32)
           .at[:hidden].set(b2a.reshape(-1))
           .at[hidden:2 * hidden].set(b2b.reshape(-1)))

    # Layer 3: block-diagonal (hf, 2), columns padded to out_w lanes.
    # Column 0 = Q1, column 1 = Q2, the rest are zeros (free padding FLOPs).
    w3f = jnp.zeros((hf, out_w), jnp.float32)
    w3f = (w3f.at[:hidden, 0:1].set(w3a)
              .at[hidden:2 * hidden, 1:2].set(w3b))
    b3f = (jnp.zeros((out_w,), jnp.float32)
           .at[0].set(b3a.reshape(()))
           .at[1].set(b3b.reshape(())))

    # Pack the three biases into one (3, W) slab -> one DMA instead of three.
    bias_w = max(hf, out_w)
    bias_pack = (jnp.zeros((3, bias_w), jnp.float32)
                 .at[0, :hf].set(b1f)
                 .at[1, :hf].set(b2f)
                 .at[2, :out_w].set(b3f))

    # Pre-split W1 rows by (state | action) so the kernel never concatenates.
    w1_state = w1f[:state_dim]
    w1_action = w1f[state_dim:]
    return (w1_state, w1_action, w2f, w3f, bias_pack)


# ---------------------------------------------------------------------------
# Forward wrapper.
# ---------------------------------------------------------------------------
@jax.jit
def double_q_forward(state, action, fused_params):
    w1s, w1a, w2f, w3f, bias_pack = fused_params
    in_dtype = state.dtype
    state = state.astype(jnp.float32)
    action = action.astype(jnp.float32)

    batch, state_dim = state.shape
    action_dim = action.shape[1]
    hf = w1s.shape[1]
    out_w = w3f.shape[1]

    # Batch tile: multiple of 8 (f32 sublanes); capped so huge RL batches split
    # across grid steps (and across v7x's two TensorCores via "parallel").
    tb = min(_MAX_TB, _round_up(batch, _SUBLANE))
    padded = _round_up(batch, tb)
    if padded != batch:
        state = jnp.pad(state, ((0, padded - batch), (0, 0)))
        action = jnp.pad(action, ((0, padded - batch), (0, 0)))
    grid = (padded // tb,)

    flops = 2 * padded * (state_dim * hf + action_dim * hf
                          + hf * hf + hf * out_w)
    bytes_accessed = 4 * (padded * (state_dim + action_dim + out_w)
                          + (state_dim + action_dim) * hf
                          + hf * hf + hf * out_w
                          + 3 * max(hf, out_w))

    out = pl.pallas_call(
        _fused_double_q_kernel,
        out_shape=jax.ShapeDtypeStruct((padded, out_w), jnp.float32),
        grid=grid,
        in_specs=[
            pl.BlockSpec((tb, state_dim), lambda i: (i, 0)),
            pl.BlockSpec((tb, action_dim), lambda i: (i, 0)),
            # Weights / biases: full-array, grid-invariant blocks (they stay
            # resident in VMEM across batch-tile grid steps, no re-DMA).
            pl.BlockSpec(w1s.shape, lambda i: (0, 0)),
            pl.BlockSpec(w1a.shape, lambda i: (0, 0)),
            pl.BlockSpec(w2f.shape, lambda i: (0, 0)),
            pl.BlockSpec(w3f.shape, lambda i: (0, 0)),
            pl.BlockSpec(bias_pack.shape, lambda i: (0, 0)),
        ],
        out_specs=pl.BlockSpec((tb, out_w), lambda i: (i, 0)),
        compiler_params=pltpu.CompilerParams(
            dimension_semantics=("parallel",)),
        cost_estimate=pl.CostEstimate(
            flops=flops, transcendentals=0, bytes_accessed=bytes_accessed),
    )(state, action, w1s, w1a, w2f, w3f, bias_pack)

    # Q1 / Q2 live in output lanes 0 and 1 of the lane-dense slab.
    q1 = out[:batch, 0:1].astype(in_dtype)
    q2 = out[:batch, 1:2].astype(in_dtype)
    return q1, q2


# ---------------------------------------------------------------------------
# Parameter init (PyTorch nn.Linear default: U(-1/sqrt(fan_in), 1/sqrt(fan_in)))
# ---------------------------------------------------------------------------
def _init_linear(key, fan_in, fan_out):
    kw, kb = jax.random.split(key)
    bound = 1.0 / jnp.sqrt(jnp.float32(fan_in))
    w = jax.random.uniform(kw, (fan_in, fan_out), jnp.float32, -bound, bound)
    b = jax.random.uniform(kb, (1, fan_out), jnp.float32, -bound, bound)
    return w, b


def init_critic_params(key, in_dim, hidden_dim):
    k1, k2, k3 = jax.random.split(key, 3)
    w1, b1 = _init_linear(k1, in_dim, hidden_dim)
    w2, b2 = _init_linear(k2, hidden_dim, hidden_dim)
    w3, b3 = _init_linear(k3, hidden_dim, 1)
    return (w1, b1, w2, b2, w3, b3)


if __name__ == "__main__":
    # Small shapes consistent with the module.
    batch = 8
    state_dim = 12
    action_dim = 4
    hidden_dim = 32

    root = jax.random.PRNGKey(0)
    k_state, k_action, k_net1, k_net2 = jax.random.split(root, 4)

    state = jax.random.normal(k_state, (batch, state_dim), jnp.float32)
    action = jax.random.normal(k_action, (batch, action_dim), jnp.float32)

    params1 = init_critic_params(k_net1, state_dim + action_dim, hidden_dim)
    params2 = init_critic_params(k_net2, state_dim + action_dim, hidden_dim)

    # One-time fusion / packing of both critics' params (outside jit).
    fused = fuse_critic_params(params1, params2, state_dim)

    q1, q2 = double_q_forward(state, action, fused)
    jax.block_until_ready((q1, q2))

    # Reference check in plain JAX (same math, same unfused params).
    x = jnp.concatenate([state, action], axis=1)

    def ref_critic(p):
        w1, b1, w2, b2, w3, b3 = p
        h1 = jnp.maximum(x @ w1 + b1, 0.0)
        h2 = jnp.maximum(h1 @ w2 + b2, 0.0)
        return h2 @ w3 + b3

    r1, r2 = ref_critic(params1), ref_critic(params2)
    assert q1.shape == (batch, 1) and q2.shape == (batch, 1)
    assert jnp.allclose(q1, r1, atol=1e-5), jnp.max(jnp.abs(q1 - r1))
    assert jnp.allclose(q2, r2, atol=1e-5), jnp.max(jnp.abs(q2 - r2))

    print("KERNEL_OK")
</pallas_src>

<mosaic_0001>
module attributes {stable_mosaic.version = 11 : i64} {
  func.func @_fused_double_q_kernel(%arg0: i32, %arg1: memref<8x12xf32, #tpu.memory_space<vmem>>, %arg2: memref<8x4xf32, #tpu.memory_space<vmem>>, %arg3: memref<12x128xf32, #tpu.memory_space<vmem>>, %arg4: memref<4x128xf32, #tpu.memory_space<vmem>>, %arg5: memref<128x128xf32, #tpu.memory_space<vmem>>, %arg6: memref<128x128xf32, #tpu.memory_space<vmem>>, %arg7: memref<3x128xf32, #tpu.memory_space<vmem>>, %arg8: memref<8x128xf32, #tpu.memory_space<vmem>>) attributes {dimension_semantics = [#tpu.dimension_semantics<parallel>], iteration_bounds = array<i64: 1>, scalar_prefetch = 0 : i64, scratch_operands = 0 : i64, tpu.core_type = #tpu.core_type<tc>, window_params = [{transform_indices = @transform_0, window_bounds = array<i64: 8, 12>}, {transform_indices = @transform_1, window_bounds = array<i64: 8, 4>}, {pipeline_mode = #tpu.pipeline_mode<synchronous>, transform_indices = @transform_2, window_bounds = array<i64: 12, 128>}, {pipeline_mode = #tpu.pipeline_mode<synchronous>, transform_indices = @transform_3, window_bounds = array<i64: 4, 128>}, {pipeline_mode = #tpu.pipeline_mode<synchronous>, transform_indices = @transform_4, window_bounds = array<i64: 128, 128>}, {pipeline_mode = #tpu.pipeline_mode<synchronous>, transform_indices = @transform_5, window_bounds = array<i64: 128, 128>}, {pipeline_mode = #tpu.pipeline_mode<synchronous>, transform_indices = @transform_6, window_bounds = array<i64: 3, 128>}, {transform_indices = @transform_7, window_bounds = array<i64: 8, 128>}]} {
    %c0 = arith.constant 0 : index
    %c0_0 = arith.constant 0 : index
    %0 = vector.load %arg7[%c0, %c0_0] : memref<3x128xf32, #tpu.memory_space<vmem>>, vector<3x128xf32>
    %1 = vector.extract_strided_slice %0 {offsets = [0, 0], sizes = [1, 128], strides = [1, 1]} : vector<3x128xf32> to vector<1x128xf32>
    %2 = vector.extract_strided_slice %0 {offsets = [1, 0], sizes = [1, 128], strides = [1, 1]} : vector<3x128xf32> to vector<1x128xf32>
    %3 = vector.extract_strided_slice %0 {offsets = [2, 0], sizes = [1, 128], strides = [1, 1]} : vector<3x128xf32> to vector<1x128xf32>
    %c0_1 = arith.constant 0 : index
    %c0_2 = arith.constant 0 : index
    %4 = vector.load %arg1[%c0_1, %c0_2] : memref<8x12xf32, #tpu.memory_space<vmem>>, vector<8x12xf32>
    %c0_3 = arith.constant 0 : index
    %c0_4 = arith.constant 0 : index
    %5 = vector.load %arg3[%c0_3, %c0_4] : memref<12x128xf32, #tpu.memory_space<vmem>>, vector<12x128xf32>
    %cst = arith.constant dense<0.000000e+00> : vector<8x128xf32>
    %6 = tpu.matmul %4, %5, %cst {dimension_numbers = #tpu.dot_dimension_numbers<[1], [0], [0], [1], [0, 0, 1, 1], [], []>} : vector<8x12xf32>, vector<12x128xf32>, vector<8x128xf32> -> vector<8x128xf32>
    %c0_5 = arith.constant 0 : index
    %c0_6 = arith.constant 0 : index
    %7 = vector.load %arg2[%c0_5, %c0_6] : memref<8x4xf32, #tpu.memory_space<vmem>>, vector<8x4xf32>
    %c0_7 = arith.constant 0 : index
    %c0_8 = arith.constant 0 : index
    %8 = vector.load %arg4[%c0_7, %c0_8] : memref<4x128xf32, #tpu.memory_space<vmem>>, vector<4x128xf32>
    %cst_9 = arith.constant dense<0.000000e+00> : vector<8x128xf32>
    %9 = tpu.matmul %7, %8, %cst_9 {dimension_numbers = #tpu.dot_dimension_numbers<[1], [0], [0], [1], [0, 0, 1, 1], [], []>} : vector<8x4xf32>, vector<4x128xf32>, vector<8x128xf32> -> vector<8x128xf32>
    %10 = arith.addf %6, %9 : vector<8x128xf32>
    %11 = vector.broadcast %1 : vector<1x128xf32> to vector<8x128xf32>
    %12 = arith.addf %10, %11 : vector<8x128xf32>
    %cst_10 = arith.constant 0.000000e+00 : f32
    %13 = vector.broadcast %cst_10 : f32 to vector<8x128xf32>
    %14 = arith.maximumf %12, %13 : vector<8x128xf32>
    %c0_11 = arith.constant 0 : index
    %c0_12 = arith.constant 0 : index
    %15 = vector.load %arg5[%c0_11, %c0_12] : memref<128x128xf32, #tpu.memory_space<vmem>>, vector<128x128xf32>
    %cst_13 = arith.constant dense<0.000000e+00> : vector<8x128xf32>
    %16 = tpu.matmul %14, %15, %cst_13 {dimension_numbers = #tpu.dot_dimension_numbers<[1], [0], [0], [1], [0, 0, 1, 1], [], []>} : vector<8x128xf32>, vector<128x128xf32>, vector<8x128xf32> -> vector<8x128xf32>
    %17 = vector.broadcast %2 : vector<1x128xf32> to vector<8x128xf32>
    %18 = arith.addf %16, %17 : vector<8x128xf32>
    %cst_14 = arith.constant 0.000000e+00 : f32
    %19 = vector.broadcast %cst_14 : f32 to vector<8x128xf32>
    %20 = arith.maximumf %18, %19 : vector<8x128xf32>
    %c0_15 = arith.constant 0 : index
    %c0_16 = arith.constant 0 : index
    %21 = vector.load %arg6[%c0_15, %c0_16] : memref<128x128xf32, #tpu.memory_space<vmem>>, vector<128x128xf32>
    %cst_17 = arith.constant dense<0.000000e+00> : vector<8x128xf32>
    %22 = tpu.matmul %20, %21, %cst_17 {dimension_numbers = #tpu.dot_dimension_numbers<[1], [0], [0], [1], [0, 0, 1, 1], [], []>} : vector<8x128xf32>, vector<128x128xf32>, vector<8x128xf32> -> vector<8x128xf32>
    %23 = vector.broadcast %3 : vector<1x128xf32> to vector<8x128xf32>
    %24 = arith.addf %22, %23 : vector<8x128xf32>
    %c0_18 = arith.constant 0 : index
    %c0_19 = arith.constant 0 : index
    %25 = vector.load %arg8[%c0_18, %c0_19] : memref<8x128xf32, #tpu.memory_space<vmem>>, vector<8x128xf32>
    tpu.vector_store %arg8[%c0_18, %c0_19], %24 {strides = array<i32>} : memref<8x128xf32, #tpu.memory_space<vmem>>, vector<8x128xf32>,
    return
  }
  func.func @transform_0(%arg0: i32) -> (i32, i32) {
    %c0_i32 = arith.constant 0 : i32
    %c0_i32_0 = arith.constant 0 : i32
    return %arg0, %c0_i32 : i32, i32
  }
  func.func @transform_1(%arg0: i32) -> (i32, i32) {
    %c0_i32 = arith.constant 0 : i32
    %c0_i32_0 = arith.constant 0 : i32
    return %arg0, %c0_i32 : i32, i32
  }
  func.func @transform_2(%arg0: i32) -> (i32, i32) {
    %c0_i32 = arith.constant 0 : i32
    %c0_i32_0 = arith.constant 0 : i32
    %c0_i32_1 = arith.constant 0 : i32
    return %c0_i32, %c0_i32_0 : i32, i32
  }
  func.func @transform_3(%arg0: i32) -> (i32, i32) {
    %c0_i32 = arith.constant 0 : i32
    %c0_i32_0 = arith.constant 0 : i32
    %c0_i32_1 = arith.constant 0 : i32
    return %c0_i32, %c0_i32_0 : i32, i32
  }
  func.func @transform_4(%arg0: i32) -> (i32, i32) {
    %c0_i32 = arith.constant 0 : i32
    %c0_i32_0 = arith.constant 0 : i32
    %c0_i32_1 = arith.constant 0 : i32
    return %c0_i32, %c0_i32_0 : i32, i32
  }
  func.func @transform_5(%arg0: i32) -> (i32, i32) {
    %c0_i32 = arith.constant 0 : i32
    %c0_i32_0 = arith.constant 0 : i32
    %c0_i32_1 = arith.constant 0 : i32
    return %c0_i32, %c0_i32_0 : i32, i32
  }
  func.func @transform_6(%arg0: i32) -> (i32, i32) {
    %c0_i32 = arith.constant 0 : i32
    %c0_i32_0 = arith.constant 0 : i32
    %c0_i32_1 = arith.constant 0 : i32
    return %c0_i32, %c0_i32_0 : i32, i32
  }
  func.func @transform_7(%arg0: i32) -> (i32, i32) {
    %c0_i32 = arith.constant 0 : i32
    %c0_i32_0 = arith.constant 0 : i32
    return %arg0, %c0_i32 : i32, i32
  }
}

</mosaic_0001>

<bundles_post_ra>
// kernel: double_q_forward.1
= control target key start
LH: loop header
LB: loop body
LE: loop exit
PB: predicated region body
PF: predicated region fallthrough
CT: control target
= control target key end

     0   :  { %12 = vsyncpa [#allocation3], 0  ;;  %s806_s0 = inlined_call_operand.hbm [shape: f32[8,12], index: 0, kind: input, shape index: {}]   ;;  %s807_s1 = inlined_call_operand.vmem [shape: f32[8,4], index: 1, kind: input, shape index: {}]   ;;  %s808_s2 = inlined_call_operand.vmem [shape: f32[12,128], index: 2, kind: input, shape index: {}]   ;;  %s809_s3 = inlined_call_operand.vmem [shape: f32[4,128], index: 3, kind: input, shape index: {}]   ;;  %s810_s4 = inlined_call_operand.hbm [shape: f32[128,128], index: 4, kind: input, shape index: {}]   ;;  %s811_s5 = inlined_call_operand.hbm [shape: f32[128,128], index: 5, kind: input, shape index: {}]   ;;  %s812_s6 = inlined_call_operand.vmem [shape: f32[3,128], index: 6, kind: input, shape index: {}]   ;;  %s813_s7 = inlined_call_operand.vmem [shape: f32[8,128], index: 7, kind: output, shape index: {}]  }
   0x1   :  { %13 = vsyncpa [#allocation5], 0  ;;  %s676_s24 = smov [#allocation4]   ;;  %s606_s28 = scalar_lea.hbm %s810_s4, 2048 }
   0x2   :  { %s35_s25 = sshll.u32 %s676_s24, 4  ;;  %p607_p0 = scmp.ne.s32.totalorder %s810_s4, %s606_s28  ;;  %s36_s25 = int_to_ptr.vmem [resolvable:$true] %s35_s25 }
   0x3   :  { %p610_p1 = scmp.lt.u32.totalorder %s606_s28, %s810_s4 }
   0x5   :  { %p612_p2 = pnand %p610_p1, %p607_p0 }
   0x7   :  { %615 = shalt.err (!%p612_p2)
}
   0x8   :  { %s616_s10 = scalar_lea.vmem %s36_s25, 2048  ;;  %p621_p4 = scmp.lt.s32.totalorder %s36_s25, %s36_s25 }
   0x9   :  { %p617_p3 = scmp.ne.s32.totalorder %s36_s25, %s616_s10  ;;  %p622_p5 = scmp.lt.s32.totalorder %s616_s10, %s616_s10 }
   0xb   :  { %p623_p6 = por %p622_p5, %p621_p4 }
   0xd   :  { %p624_p7 = pnand %p623_p6, %p617_p3 }
   0xf   :  { %627 = shalt.err (!%p624_p7)
}
  0x10   :  { %s677_s11 = smov 128   ;;  %s678_s12 = smov 8  }
  0x11   :  { %41 = dma.hbm_to_vmem [thread:$0]  %s810_s4, 2048, %s36_s25, [#allocation5], %s677_s11, %s677_s11, %s678_s12  }
  0x12   :  { %s679_s15 = smov [#allocation2]   ;;  %s680_s17 = smov [#allocation6]  }
  0x13   :  { %s20_s16 = sshll.u32 %s679_s15, 4  ;;  %s47_s18 = sshll.u32 %s680_s17, 4  ;;  %s21_s16 = int_to_ptr.vmem [resolvable:$true] %s20_s16  ;;  %s48_s18 = int_to_ptr.vmem [resolvable:$true] %s47_s18 }
  0x14   :  { %s628_s21 = scalar_lea.hbm %s806_s0, 128 }
  0x15   :  { %p629_p8 = scmp.ne.s32.totalorder %s806_s0, %s628_s21  ;;  %p632_p9 = scmp.lt.u32.totalorder %s628_s21, %s806_s0 }
  0x17   :  { %p634_p10 = pnand %p632_p9, %p629_p8 }
  0x19   :  { %637 = shalt.err (!%p634_p10)
}
  0x1a   :  { %s638_s4 = scalar_lea.vmem %s21_s16, 128  ;;  %p643_p12 = scmp.lt.s32.totalorder %s21_s16, %s21_s16 }
  0x1b   :  { %p639_p11 = scmp.ne.s32.totalorder %s21_s16, %s638_s4  ;;  %p644_p13 = scmp.lt.s32.totalorder %s638_s4, %s638_s4 }
  0x1d   :  { %p645_p0 = por %p644_p13, %p643_p12 }
  0x1f   :  { %p646_p1 = pnand %p645_p0, %p639_p11 }
  0x21   :  { %649 = shalt.err (!%p646_p1)
}
  0x22   :  { %23 = dma.hbm_to_vmem [thread:$0]  %s806_s0, 128, %s21_s16, [#allocation3]  }
  0x23   :  { %s650_s30 = scalar_lea.hbm %s811_s5, 2048 }
  0x24   :  { %p651_p2 = scmp.ne.s32.totalorder %s811_s5, %s650_s30  ;;  %p654_p3 = scmp.lt.u32.totalorder %s650_s30, %s811_s5 }
  0x26   :  { %p656_p4 = pnand %p654_p3, %p651_p2 }
  0x28   :  { %659 = shalt.err (!%p656_p4)
}
  0x29   :  { %s660_s14 = scalar_lea.vmem %s48_s18, 2048  ;;  %p665_p6 = scmp.lt.s32.totalorder %s48_s18, %s48_s18 }
  0x2a   :  { %p661_p5 = scmp.ne.s32.totalorder %s48_s18, %s660_s14  ;;  %p666_p7 = scmp.lt.s32.totalorder %s660_s14, %s660_s14 }
  0x2c   :  { %p667_p8 = por %p666_p7, %p665_p6 }
  0x2e   :  { %p668_p9 = pnand %p667_p8, %p661_p5 }
  0x30   :  { %671 = shalt.err (!%p668_p9)
}
  0x31   :  { %53 = dma.hbm_to_vmem [thread:$0]  %s811_s5, 2048, %s48_s18, [#allocation5], %s677_s11, %s677_s11, %s678_s12  }
  0x32   :  { %672 = dma.done.wait [#allocation3], 128  }
  0x33   :  { %673 = vsyncadd [#allocation3], 4294967168 }
  0x34   :  { %674 = dma.done.wait [#allocation5], 4096  }
  0x35   :  { %675 = vsyncadd [#allocation5], 4294963200  ;;  %v681_v0 = vmov 0.0|0.0   ;;  %v682_v1 = vmov 0.0   ;;  %vm683_vm0 = vmmov 0   ;;  %vm75_vm1 = vcmask 1043456  }
  0x36   :  { %545 = vmatprep.subr.bf16.mxu1 %v681_v0  ;;  %463 = vmatprep.subr.mxu0 %v682_v1  ;;  %vm684_vm2 = vmmov 1   ;;  %vm71_vm4 = vcmask 31744   ;;  %v67_v2 = vld [vmem:[%s808_s2] sm:$0xff]  ;;  %v68_v3 = vld [vmem:[%s808_s2 + $0x8] sm:$0xf]  ;;  %v233_v8 = vld [vmem:[#allocation4 + $0x8] sm:$0xff]  ;;  %v226_v53 = vlaneseq }
  0x37   :  { %465 = vmatprep.mubr.msk.f32.mxu0 %vm683_vm0, %v682_v1  ;;  %472 = vmatprep.mubr.msk.f32.mxu1 %vm683_vm0, %v682_v1  ;;  %vm547_vm3 = vmpackc.low %vm75_vm1, %vm684_vm2  ;;  %v70_v4 = vld [vmem:[%s809_s3] sm:$0xf]  ;;  %v546_v5 = vpack.c.bf16 %v68_v3, %v67_v2  ;;  %v232_v7 = vld [vmem:[#allocation4] sm:$0xff]  ;;  %vm149_vm5 = vcmask 97280  }
  0x38   :  { %464 = vmatpush3.msk.msra.mxu0 %vm75_vm1, %v70_v4  ;;  %v69_v6 = vld [vmem:[%s807_s1] sm:$0xff]  ;;  %v234_v9 = vld [vmem:[#allocation4 + $0x10] sm:$0xff]  ;;  %v550_v12 = vpack.c.bf16 %v233_v8, %v232_v7  ;;  %v236_v14 = vld [vmem:[#allocation4 + $0x20] sm:$0xff]  ;;  %v227_v54 = vshrl.u32 %v226_v53, 7 }
  0x39   :  { %466 = vmatmul.mubr.msk.f32.vlgmr.msra.gmra.mrb[0].mxu0 %vm71_vm4, %v69_v6  ;;  %549 = vmatprep.subr.bf16.mxu0 %v681_v0  ;;  %v235_v10 = vld [vmem:[#allocation4 + $0x18] sm:$0xff]  ;;  %v237_v15 = vld [vmem:[#allocation4 + $0x28] sm:$0xff]  ;;  %v238_v17 = vld [vmem:[#allocation4 + $0x30] sm:$0xff] }
  0x3a   :  { %548 = vmatpush3.bf16.msk.msra.mxu1 %vm547_vm3, %v546_v5  ;;  %v66_v11 = vld [vmem:[#allocation2] sm:$0xff]  ;;  %507 = vmatprep.mubr.msk.f32.mxu0 %vm683_vm0, %v682_v1  ;;  %v553_v13 = vpack.c.bf16 %v235_v10, %v234_v9  ;;  %v556_v16 = vpack.c.bf16 %v237_v15, %v236_v14  ;;  %v240_v20 = vld [vmem:[#allocation4 + $0x40] sm:$0xff]  ;;  %v241_v21 = vld [vmem:[#allocation4 + $0x48] sm:$0xff]  ;;  %v228_v55 = vsub.s32 0, %v227_v54  ;;  %v341_v10 = vsub.s32 2, %v227_v54 }
  0x3b   :  { %573 = vmatprep.subr.bf16.mxu1 %v681_v0  ;;  %551 = vmatpush3.bf16.msra.mxu0 %v550_v12  ;;  %v239_v18 = vld [vmem:[#allocation4 + $0x38] sm:$0xff]  ;;  %v562_v22 = vpack.c.bf16 %v241_v21, %v240_v20  ;;  %v242_v23 = vld [vmem:[#allocation4 + $0x50] sm:$0xff]  ;;  %v244_v26 = vld [vmem:[#allocation4 + $0x60] sm:$0xff] }
  0x3c   :  { %552 = vmatprep.subr.bf16.mxu0 %v681_v0  ;;  %v559_v19 = vpack.c.bf16 %v239_v18, %v238_v17  ;;  %v243_v24 = vld [vmem:[#allocation4 + $0x58] sm:$0xff]  ;;  %v245_v27 = vld [vmem:[#allocation4 + $0x68] sm:$0xff]  ;;  %v246_v29 = vld [vmem:[#allocation4 + $0x70] sm:$0xff] }
  0x3d   :  { %473 = vmatmul.mubr.msk.f32.vlgmr.msra.gmra.mrb[0].mxu1 %vm149_vm5, %v66_v11  ;;  %v565_v25 = vpack.c.bf16 %v243_v24, %v242_v23  ;;  %v568_v28 = vpack.c.bf16 %v245_v27, %v244_v26  ;;  %v247_v30 = vld [vmem:[#allocation4 + $0x78] sm:$0xff]  ;;  %v323_v32 = vld [vmem:[#allocation6] sm:$0xff]  ;;  %v324_v33 = vld [vmem:[#allocation6 + $0x8] sm:$0xff] }
  0x3e   :  { %542 = vmatprep.mubr.msk.f32.mxu1 %vm683_vm0, %v682_v1  ;;  %v571_v31 = vpack.c.bf16 %v247_v30, %v246_v29  ;;  %v325_v34 = vld [vmem:[#allocation6 + $0x10] sm:$0xff]  ;;  %v574_v35 = vpack.c.bf16 %v324_v33, %v323_v32  ;;  %v326_v36 = vld [vmem:[#allocation6 + $0x18] sm:$0xff]  ;;  %v327_v38 = vld [vmem:[#allocation6 + $0x20] sm:$0xff] }
  0x3f   :  { %554 = vmatpush3.bf16.msra.mxu0 %v553_v13  ;;  %v577_v37 = vpack.c.bf16 %v326_v36, %v325_v34  ;;  %v328_v39 = vld [vmem:[#allocation6 + $0x28] sm:$0xff]  ;;  %v329_v41 = vld [vmem:[#allocation6 + $0x30] sm:$0xff]  ;;  %v330_v42 = vld [vmem:[#allocation6 + $0x38] sm:$0xff] }
  0x40   :  { %555 = vmatprep.subr.bf16.mxu0 %v681_v0  ;;  %575 = vmatpush3.bf16.msra.mxu1 %v574_v35  ;;  %v580_v40 = vpack.c.bf16 %v328_v39, %v327_v38  ;;  %v583_v43 = vpack.c.bf16 %v330_v42, %v329_v41  ;;  %v331_v44 = vld [vmem:[#allocation6 + $0x40] sm:$0xff]  ;;  %v332_v45 = vld [vmem:[#allocation6 + $0x48] sm:$0xff]  ;;  %v333_v47 = vld [vmem:[#allocation6 + $0x50] sm:$0xff] }
  0x41   :  { %576 = vmatprep.subr.bf16.mxu1 %v681_v0  ;;  %v586_v46 = vpack.c.bf16 %v332_v45, %v331_v44  ;;  %v334_v48 = vld [vmem:[#allocation6 + $0x58] sm:$0xff]  ;;  %v335_v50 = vld [vmem:[#allocation6 + $0x60] sm:$0xff]  ;;  %v336_v51 = vld [vmem:[#allocation6 + $0x68] sm:$0xff] }
  0x42   :  { %v589_v49 = vpack.c.bf16 %v334_v48, %v333_v47  ;;  %v592_v52 = vpack.c.bf16 %v336_v51, %v335_v50  ;;  %v65_v57 = vld [vmem:[%s812_s6] sm:$0x7]  ;;  %v337_v2 = vld [vmem:[#allocation6 + $0x70] sm:$0xff] }
  0x43   :  { %557 = vmatpush3.bf16.msra.mxu0 %v556_v16  ;;  %v229_v59 = vrot.slane %v65_v57, %v228_v55  ;;  %v338_v3 = vld [vmem:[#allocation6 + $0x78] sm:$0xff]  ;;  %v342_v11 = vrot.slane %v65_v57, %v341_v10 }
  0x44   :  { %558 = vmatprep.subr.bf16.mxu0 %v681_v0  ;;  %578 = vmatpush3.bf16.msra.mxu1 %v577_v37  ;;  %v595_v4 = vpack.c.bf16 %v338_v3, %v337_v2 }
  0x45   :  { %579 = vmatprep.subr.bf16.mxu1 %v681_v0 }
  0x47   :  { %560 = vmatpush3.bf16.msra.mxu0 %v559_v19 }
  0x48   :  { %561 = vmatprep.subr.bf16.mxu0 %v681_v0  ;;  %581 = vmatpush3.bf16.msra.mxu1 %v580_v40 }
  0x49   :  { %582 = vmatprep.subr.bf16.mxu1 %v681_v0 }
  0x4b   :  { %563 = vmatpush3.bf16.msra.mxu0 %v562_v22 }
  0x4c   :  { %564 = vmatprep.subr.bf16.mxu0 %v681_v0  ;;  %584 = vmatpush3.bf16.msra.mxu1 %v583_v43 }
  0x4d   :  { %585 = vmatprep.subr.bf16.mxu1 %v681_v0 }
  0x4f   :  { %566 = vmatpush3.bf16.msra.mxu0 %v565_v25 }
  0x50   :  { %567 = vmatprep.subr.bf16.mxu0 %v681_v0  ;;  %587 = vmatpush3.bf16.msra.mxu1 %v586_v46 }
  0x51   :  { %588 = vmatprep.subr.bf16.mxu1 %v681_v0 }
  0x53   :  { %569 = vmatpush3.bf16.msra.mxu0 %v568_v28 }
  0x54   :  { %570 = vmatprep.subr.bf16.mxu0 %v681_v0  ;;  %590 = vmatpush3.bf16.msra.mxu1 %v589_v49 }
  0x55   :  { %591 = vmatprep.subr.bf16.mxu1 %v681_v0 }
  0x57   :  { %572 = vmatpush3.bf16.msra.mxu0 %v571_v31 }
  0x58   :  { %593 = vmatpush3.bf16.msra.mxu1 %v592_v52 }
  0x59   :  { %594 = vmatprep.subr.bf16.mxu1 %v681_v0  ;;  %v250_v0 = vsub.s32 1, %v227_v54 }
  0x5b   :  { %v251_v5 = vrot.slane %v65_v57, %v250_v0 }
  0x5c   :  { %596 = vmatpush3.bf16.msra.mxu1 %v595_v4 }
 0x10c   :  { %v145_v56 = vpop.f32.mrb[0].mxu0 }
 0x10d   :  { %v467_v58 = vpop.f32.mrb[1].mxu0 }
 0x110   :  { %v222_v60 = vpop.f32.mrb[0].mxu1 }
 0x111   :  { %v223_v61 = vadd.f32 %v222_v60, %v145_v56  ;;  %v474_v62 = vpop.f32.mrb[1].mxu1 }
 0x113   :  { %v230_v63 = vadd.f32 %v229_v59, %v223_v61 }
 0x115   :  { %v231_v1 = vmax.f32 %v230_v63, 0.0 }
 0x117   :  { %508 = vmatmul.mubr.f32.vlgmr.msra.gmra.mrb[2].mxu0 %v231_v1 }
 0x1ea   :  { %v318_v6 = vpop.f32.mrb[2].mxu0 }
 0x1eb   :  { %v319_v7 = vadd.f32 %v318_v6, %v251_v5  ;;  %v509_v8 = vpop.f32.mrb[3].mxu0 }
 0x1ed   :  { %v322_v9 = vmax.f32 %v319_v7, 0.0 }
 0x1ef   :  { %543 = vmatmul.mubr.f32.vlgmr.msra.gmra.mrb[2].mxu1 %v322_v9 }
 0x2c2   :  { %v409_v12 = vpop.f32.mrb[2].mxu1 }
 0x2c3   :  { %v410_v13 = vadd.f32 %v409_v12, %v342_v11  ;;  %v544_v14 = vpop.f32.mrb[3].mxu1 }
 0x2c5   :  { %413 = vst [vmem:[%s813_s7] sm:$0xff] %v410_v13 }
 0x2c6   :  { %418 = vsyncpa [#allocation3], 1 }
 0x2c7   :  { %419 = vsyncpa [#allocation5], 1 }

</bundles_post_ra>
